<compile_context>
chip_gen: v5e
topology: v5e:2x2
jax: 0.10.0
libtpu: 0.0.40
codegen_flags: <defaults>
</compile_context>

<pallas_src>
import jax
import jax.numpy as jnp
from jax.experimental import pallas as pl
from jax.experimental.pallas import tpu as pltpu


def _round_up(x: int, m: int) -> int:
    return (x + m - 1) // m * m


def _k_tiling(in_dim: int):
    """Pick the K (input-feature) tile: full width when small, 512 when large."""
    in_128 = _round_up(in_dim, 128)
    if in_128 > 2048:
        tk = 512
        in_p = _round_up(in_128, tk)
    else:
        tk = in_128
        in_p = in_128
    return in_p, tk, in_p // tk


# --------------------------------------------------------------------------
# Kernel: grid = (batch tiles [parallel], K tiles [arbitrary, last]).
# fc1 accumulates x@W1 over K tiles into an f32 VMEM scratch; on the last K
# step the bias/ReLU/fc2 epilogue runs and the (tm, out_p) tile is stored.
# --------------------------------------------------------------------------
def mlp_kernel(x_ref, w1_ref, b1_ref, w2_ref, b2_ref, o_ref, acc_ref):
    k = pl.program_id(1)

    @pl.when(k == 0)
    def _init():
        acc_ref[...] = jnp.zeros_like(acc_ref)

    # fc1 partial product: (tm, tk)bf16 @ (tk, hid_p)bf16 -> f32 on the MXU.
    acc_ref[...] += jnp.dot(x_ref[...], w1_ref[...],
                            preferred_element_type=jnp.float32)

    @pl.when(k == pl.num_programs(1) - 1)
    def _finalize():
        h = jnp.maximum(acc_ref[...] + b1_ref[...], 0.0)      # f32 VPU epilogue
        out = jnp.dot(h.astype(w2_ref.dtype), w2_ref[...],
                      preferred_element_type=jnp.float32)
        o_ref[...] = (out + b2_ref[...]).astype(o_ref.dtype)


# --------------------------------------------------------------------------
# One-time parameter preparation (hoisted out of the forward).
# Weights stored transposed (in_features, out_features), padded lane-dense
# and cast to bf16 once; biases kept f32, padded to (1, dim).
# --------------------------------------------------------------------------
def prepare_params(w1, b1, w2, b2):
    in_dim, hidden_dim = w1.shape
    out_dim = w2.shape[1]
    assert w2.shape[0] == hidden_dim and b1.shape == (hidden_dim,)
    assert b2.shape == (out_dim,)

    in_p, tk, grid_k = _k_tiling(in_dim)
    hid_p = _round_up(hidden_dim, 128)
    out_p = _round_up(out_dim, 128)

    w1_p = jnp.pad(w1.astype(jnp.bfloat16),
                   ((0, in_p - in_dim), (0, hid_p - hidden_dim)))
    w2_p = jnp.pad(w2.astype(jnp.bfloat16),
                   ((0, hid_p - hidden_dim), (0, out_p - out_dim)))
    b1_p = jnp.pad(b1.astype(jnp.float32), (0, hid_p - hidden_dim)).reshape(1, hid_p)
    b2_p = jnp.pad(b2.astype(jnp.float32), (0, out_p - out_dim)).reshape(1, out_p)

    return dict(w1=w1_p, b1=b1_p, w2=w2_p, b2=b2_p,
                in_dim=in_dim, out_dim=out_dim, tk=tk, grid_k=grid_k)


def mlp_forward(x, params):
    """x: (N, ...); flattened to (N, prod(rest)) like torch .view. Returns f32."""
    w1_p, b1_p = params["w1"], params["b1"]
    w2_p, b2_p = params["w2"], params["b2"]
    in_dim, out_dim = params["in_dim"], params["out_dim"]
    tk, grid_k = params["tk"], params["grid_k"]
    in_p = tk * grid_k
    hid_p = w1_p.shape[1]
    out_p = w2_p.shape[1]

    batch = x.shape[0]
    flat = x.reshape(batch, -1)
    assert flat.shape[1] == in_dim, "flattened feature size mismatch"

    # ---- batch tiling: even, >=2 grid steps; padding only ~8 rows/step -----
    batch_8 = _round_up(batch, 8)
    num_m = max(2, 2 * pl.cdiv(batch_8, 1024))       # even -> v7x megacore
    tm = _round_up(pl.cdiv(batch_8, num_m), 8)       # tm <= 512
    b_p = tm * num_m

    # ---- activations: cast once; pad (jnp.pad) only if actually needed -----
    x_bf = flat.astype(jnp.bfloat16)
    if (b_p, in_p) != (batch, in_dim):
        x_bf = jnp.pad(x_bf, ((0, b_p - batch), (0, in_p - in_dim)))

    # ---- VMEM budget (with headroom), esp. for v7x's 64 MiB ----------------
    w1_bufs = 2 if grid_k > 1 else 1
    vmem_bytes = (w1_bufs * tk * hid_p * 2            # w1 tile(s), bf16
                  + hid_p * out_p * 2                 # w2 (single buffer), bf16
                  + (hid_p + out_p) * 4               # biases, f32
                  + 2 * tm * tk * 2                   # x tiles, double buffered
                  + 2 * tm * out_p * 4                # out tiles, double buffered
                  + tm * hid_p * 4)                   # f32 accumulator scratch
    vmem_limit = int(min(100 * 1024 * 1024,
                         max(16 * 1024 * 1024, int(vmem_bytes * 1.5) + (2 << 20))))

    def _run(use_buffered):
        if use_buffered:
            def const_spec(shape):
                return pl.BlockSpec(shape, lambda i, k: (0, 0),
                                    pipeline_mode=pl.Buffered(1))
        else:
            def const_spec(shape):
                return pl.BlockSpec(shape, lambda i, k: (0, 0))

        w1_spec = (pl.BlockSpec((tk, hid_p), lambda i, k: (k, 0))
                   if grid_k > 1 else const_spec((tk, hid_p)))

        return pl.pallas_call(
            mlp_kernel,
            out_shape=jax.ShapeDtypeStruct((b_p, out_p), jnp.float32),
            grid_spec=pltpu.PrefetchScalarGridSpec(
                num_scalar_prefetch=0,
                grid=(num_m, grid_k),                 # reduction axis last
                in_specs=[
                    pl.BlockSpec((tm, tk), lambda i, k: (i, k)),   # activations
                    w1_spec,                                        # fc1 weight
                    const_spec((1, hid_p)),                         # fc1 bias
                    const_spec((hid_p, out_p)),                     # fc2 weight
                    const_spec((1, out_p)),                         # fc2 bias
                ],
                out_specs=pl.BlockSpec((tm, out_p), lambda i, k: (i, 0)),
                scratch_shapes=[pltpu.VMEM((tm, hid_p), jnp.float32)],
            ),
            compiler_params=pltpu.CompilerParams(
                dimension_semantics=("parallel", "arbitrary"),
                vmem_limit_bytes=vmem_limit,
            ),
        )(x_bf, w1_p, b1_p, w2_p, b2_p)

    # Buffered(1) on constant blocks is a v7x VMEM optimization; fall back
    # cleanly if this JAX build does not accept pipeline_mode on pallas_call.
    try:
        out_padded = _run(True)
    except Exception:
        out_padded = _run(False)

    # Slice padding off; return f32 explicitly (torch f32 nn.Linear parity).
    return out_padded[:batch, :out_dim]


def init_params(key, input_dim, hidden_dim, output_dim, dtype=jnp.float32):
    """Deterministic init mirroring nn.Linear's U(-1/sqrt(fan_in), 1/sqrt(fan_in))."""
    k1, k2, k3, k4 = jax.random.split(key, 4)
    lim1 = 1.0 / jnp.sqrt(input_dim)
    lim2 = 1.0 / jnp.sqrt(hidden_dim)
    # Stored as (in_features, out_features), i.e. transposed vs torch's weight.
    w1 = jax.random.uniform(k1, (input_dim, hidden_dim), dtype, -lim1, lim1)
    b1 = jax.random.uniform(k2, (hidden_dim,), dtype, -lim1, lim1)
    w2 = jax.random.uniform(k3, (hidden_dim, output_dim), dtype, -lim2, lim2)
    b2 = jax.random.uniform(k4, (output_dim,), dtype, -lim2, lim2)
    return w1, b1, w2, b2


if __name__ == "__main__":
    key = jax.random.PRNGKey(0)
    k_x, k_p = jax.random.split(key)

    # Input: small NCHW tensor, flattened inside the forward (like x.view).
    batch, C, H, W = 2, 4, 8, 8
    input_dim = C * H * W        # 256
    hidden_dim = 32
    output_dim = 16

    x = jax.random.normal(k_x, (batch, C, H, W), jnp.float32)
    w1, b1, w2, b2 = init_params(k_p, input_dim, hidden_dim, output_dim)

    # One-time weight prep (padding + bf16 cast hoisted out of the forward).
    params = prepare_params(w1, b1, w2, b2)

    out = mlp_forward(x, params)
    out = jax.block_until_ready(out)
    assert out.shape == (batch, output_dim)
    assert out.dtype == jnp.float32

    # Reference 1: same bf16-matmul / f32-accumulate path in plain JAX.
    flat = x.reshape(batch, -1)
    h_ref = jnp.dot(flat.astype(jnp.bfloat16), w1.astype(jnp.bfloat16),
                    preferred_element_type=jnp.float32) + b1
    h_ref = jnp.maximum(h_ref, 0.0)
    ref_bf16 = jnp.dot(h_ref.astype(jnp.bfloat16), w2.astype(jnp.bfloat16),
                       preferred_element_type=jnp.float32) + b2
    assert jnp.allclose(out, ref_bf16, atol=1e-4, rtol=1e-4)

    # Reference 2: full-f32 math, loose tolerance (bf16 matmul precision).
    ref_f32 = jnp.maximum(flat @ w1 + b1, 0.0) @ w2 + b2
    assert jnp.allclose(out, ref_f32, atol=5e-2, rtol=5e-2)

    print("KERNEL_OK")
</pallas_src>

<mosaic_0001>
module attributes {stable_mosaic.version = 11 : i64} {
  func.func @mlp_kernel(%arg0: i32, %arg1: i32, %arg2: memref<8x256xbf16, #tpu.memory_space<vmem>>, %arg3: memref<256x128xbf16, #tpu.memory_space<vmem>>, %arg4: memref<1x128xf32, #tpu.memory_space<vmem>>, %arg5: memref<128x128xbf16, #tpu.memory_space<vmem>>, %arg6: memref<1x128xf32, #tpu.memory_space<vmem>>, %arg7: memref<8x128xf32, #tpu.memory_space<vmem>>, %arg8: memref<8x128xf32, #tpu.memory_space<vmem>>) attributes {dimension_semantics = [#tpu.dimension_semantics<parallel>, #tpu.dimension_semantics<arbitrary>], iteration_bounds = array<i64: 2, 1>, scalar_prefetch = 0 : i64, scratch_operands = 1 : i64, tpu.core_type = #tpu.core_type<tc>, window_params = [{transform_indices = @transform_0, window_bounds = array<i64: 8, 256>}, {pipeline_mode = #tpu.pipeline_mode<synchronous>, transform_indices = @transform_1, window_bounds = array<i64: 256, 128>}, {pipeline_mode = #tpu.pipeline_mode<synchronous>, transform_indices = @transform_2, window_bounds = array<i64: 1, 128>}, {pipeline_mode = #tpu.pipeline_mode<synchronous>, transform_indices = @transform_3, window_bounds = array<i64: 128, 128>}, {pipeline_mode = #tpu.pipeline_mode<synchronous>, transform_indices = @transform_4, window_bounds = array<i64: 1, 128>}, {transform_indices = @transform_5, window_bounds = array<i64: 8, 128>}]} {
    %c0_i32 = arith.constant 0 : i32
    %0 = arith.cmpi eq, %arg1, %c0_i32 : i32
    %1 = arith.extui %0 : i1 to i32
    %c0_i32_0 = arith.constant 0 : i32
    %2 = arith.cmpi ne, %1, %c0_i32_0 : i32
    scf.if %2 {
      %cst_10 = arith.constant 0.000000e+00 : f32
      %12 = vector.broadcast %cst_10 : f32 to vector<8x128xf32>
      %c0_11 = arith.constant 0 : index
      %c0_12 = arith.constant 0 : index
      %13 = vector.load %arg8[%c0_11, %c0_12] : memref<8x128xf32, #tpu.memory_space<vmem>>, vector<8x128xf32>
      tpu.vector_store %arg8[%c0_11, %c0_12], %12 {strides = array<i32>} : memref<8x128xf32, #tpu.memory_space<vmem>>, vector<8x128xf32>,
    } else {
    }
    %c0 = arith.constant 0 : index
    %c0_1 = arith.constant 0 : index
    %3 = vector.load %arg8[%c0, %c0_1] : memref<8x128xf32, #tpu.memory_space<vmem>>, vector<8x128xf32>
    %c0_2 = arith.constant 0 : index
    %c0_3 = arith.constant 0 : index
    %4 = vector.load %arg2[%c0_2, %c0_3] : memref<8x256xbf16, #tpu.memory_space<vmem>>, vector<8x256xbf16>
    %c0_4 = arith.constant 0 : index
    %c0_5 = arith.constant 0 : index
    %5 = vector.load %arg3[%c0_4, %c0_5] : memref<256x128xbf16, #tpu.memory_space<vmem>>, vector<256x128xbf16>
    %cst = arith.constant dense<0.000000e+00> : vector<8x128xf32>
    %6 = tpu.matmul %4, %5, %cst {dimension_numbers = #tpu.dot_dimension_numbers<[1], [0], [0], [1], [0, 0, 1, 1], [], []>} : vector<8x256xbf16>, vector<256x128xbf16>, vector<8x128xf32> -> vector<8x128xf32>
    %7 = arith.addf %3, %6 : vector<8x128xf32>
    %c0_6 = arith.constant 0 : index
    %c0_7 = arith.constant 0 : index
    %8 = vector.load %arg8[%c0_6, %c0_7] : memref<8x128xf32, #tpu.memory_space<vmem>>, vector<8x128xf32>
    tpu.vector_store %arg8[%c0_6, %c0_7], %7 {strides = array<i32>} : memref<8x128xf32, #tpu.memory_space<vmem>>, vector<8x128xf32>,
    %c0_i32_8 = arith.constant 0 : i32
    %9 = arith.cmpi eq, %arg1, %c0_i32_8 : i32
    %10 = arith.extui %9 : i1 to i32
    %c0_i32_9 = arith.constant 0 : i32
    %11 = arith.cmpi ne, %10, %c0_i32_9 : i32
    scf.if %11 {
      %c0_10 = arith.constant 0 : index
      %c0_11 = arith.constant 0 : index
      %12 = vector.load %arg8[%c0_10, %c0_11] : memref<8x128xf32, #tpu.memory_space<vmem>>, vector<8x128xf32>
      %c0_12 = arith.constant 0 : index
      %c0_13 = arith.constant 0 : index
      %13 = vector.load %arg4[%c0_12, %c0_13] : memref<1x128xf32, #tpu.memory_space<vmem>>, vector<1x128xf32>
      %14 = vector.broadcast %13 : vector<1x128xf32> to vector<8x128xf32>
      %15 = arith.addf %12, %14 : vector<8x128xf32>
      %cst_14 = arith.constant 0.000000e+00 : f32
      %16 = vector.broadcast %cst_14 : f32 to vector<8x128xf32>
      %17 = arith.maximumf %15, %16 : vector<8x128xf32>
      %18 = arith.truncf %17 : vector<8x128xf32> to vector<8x128xbf16>
      %c0_15 = arith.constant 0 : index
      %c0_16 = arith.constant 0 : index
      %19 = vector.load %arg5[%c0_15, %c0_16] : memref<128x128xbf16, #tpu.memory_space<vmem>>, vector<128x128xbf16>
      %cst_17 = arith.constant dense<0.000000e+00> : vector<8x128xf32>
      %20 = tpu.matmul %18, %19, %cst_17 {dimension_numbers = #tpu.dot_dimension_numbers<[1], [0], [0], [1], [0, 0, 1, 1], [], []>} : vector<8x128xbf16>, vector<128x128xbf16>, vector<8x128xf32> -> vector<8x128xf32>
      %c0_18 = arith.constant 0 : index
      %c0_19 = arith.constant 0 : index
      %21 = vector.load %arg6[%c0_18, %c0_19] : memref<1x128xf32, #tpu.memory_space<vmem>>, vector<1x128xf32>
      %22 = vector.broadcast %21 : vector<1x128xf32> to vector<8x128xf32>
      %23 = arith.addf %20, %22 : vector<8x128xf32>
      %c0_20 = arith.constant 0 : index
      %c0_21 = arith.constant 0 : index
      %24 = vector.load %arg7[%c0_20, %c0_21] : memref<8x128xf32, #tpu.memory_space<vmem>>, vector<8x128xf32>
      tpu.vector_store %arg7[%c0_20, %c0_21], %23 {strides = array<i32>} : memref<8x128xf32, #tpu.memory_space<vmem>>, vector<8x128xf32>,
    } else {
    }
    return
  }
  func.func @transform_0(%arg0: i32, %arg1: i32) -> (i32, i32) {
    %c0_i32 = arith.constant 0 : i32
    return %arg0, %arg1 : i32, i32
  }
  func.func @transform_1(%arg0: i32, %arg1: i32) -> (i32, i32) {
    %c0_i32 = arith.constant 0 : i32
    %c0_i32_0 = arith.constant 0 : i32
    %c0_i32_1 = arith.constant 0 : i32
    return %c0_i32, %c0_i32_0 : i32, i32
  }
  func.func @transform_2(%arg0: i32, %arg1: i32) -> (i32, i32) {
    %c0_i32 = arith.constant 0 : i32
    %c0_i32_0 = arith.constant 0 : i32
    %c0_i32_1 = arith.constant 0 : i32
    return %c0_i32, %c0_i32_0 : i32, i32
  }
  func.func @transform_3(%arg0: i32, %arg1: i32) -> (i32, i32) {
    %c0_i32 = arith.constant 0 : i32
    %c0_i32_0 = arith.constant 0 : i32
    %c0_i32_1 = arith.constant 0 : i32
    return %c0_i32, %c0_i32_0 : i32, i32
  }
  func.func @transform_4(%arg0: i32, %arg1: i32) -> (i32, i32) {
    %c0_i32 = arith.constant 0 : i32
    %c0_i32_0 = arith.constant 0 : i32
    %c0_i32_1 = arith.constant 0 : i32
    return %c0_i32, %c0_i32_0 : i32, i32
  }
  func.func @transform_5(%arg0: i32, %arg1: i32) -> (i32, i32) {
    %c0_i32 = arith.constant 0 : i32
    %c0_i32_0 = arith.constant 0 : i32
    return %arg0, %c0_i32 : i32, i32
  }
}

module attributes {stable_mosaic.version = 11 : i64} {
  func.func @mlp_kernel(%arg0: i32, %arg1: i32, %arg2: memref<8x256xbf16, #tpu.memory_space<vmem>>, %arg3: memref<256x128xbf16, #tpu.memory_space<vmem>>, %arg4: memref<1x128xf32, #tpu.memory_space<vmem>>, %arg5: memref<128x128xbf16, #tpu.memory_space<vmem>>, %arg6: memref<1x128xf32, #tpu.memory_space<vmem>>, %arg7: memref<8x128xf32, #tpu.memory_space<vmem>>, %arg8: memref<8x128xf32, #tpu.memory_space<vmem>>) attributes {dimension_semantics = [#tpu.dimension_semantics<parallel>, #tpu.dimension_semantics<arbitrary>], iteration_bounds = array<i64: 2, 1>, scalar_prefetch = 0 : i64, scratch_operands = 1 : i64, tpu.core_type = #tpu.core_type<tc>, window_params = [{transform_indices = @transform_0, window_bounds = array<i64: 8, 256>}, {pipeline_mode = #tpu.pipeline_mode<synchronous>, transform_indices = @transform_1, window_bounds = array<i64: 256, 128>}, {pipeline_mode = #tpu.pipeline_mode<synchronous>, transform_indices = @transform_2, window_bounds = array<i64: 1, 128>}, {pipeline_mode = #tpu.pipeline_mode<synchronous>, transform_indices = @transform_3, window_bounds = array<i64: 128, 128>}, {pipeline_mode = #tpu.pipeline_mode<synchronous>, transform_indices = @transform_4, window_bounds = array<i64: 1, 128>}, {transform_indices = @transform_5, window_bounds = array<i64: 8, 128>}]} {
    %c0_i32 = arith.constant 0 : i32
    %0 = arith.cmpi eq, %arg1, %c0_i32 : i32
    %1 = arith.extui %0 : i1 to i32
    %c0_i32_0 = arith.constant 0 : i32
    %2 = arith.cmpi ne, %1, %c0_i32_0 : i32
    scf.if %2 {
      %cst_10 = arith.constant 0.000000e+00 : f32
      %12 = vector.broadcast %cst_10 : f32 to vector<8x128xf32>
      %c0_11 = arith.constant 0 : index
      %c0_12 = arith.constant 0 : index
      %13 = vector.load %arg8[%c0_11, %c0_12] : memref<8x128xf32, #tpu.memory_space<vmem>>, vector<8x128xf32>
      tpu.vector_store %arg8[%c0_11, %c0_12], %12 {strides = array<i32>} : memref<8x128xf32, #tpu.memory_space<vmem>>, vector<8x128xf32>,
    } else {
    }
    %c0 = arith.constant 0 : index
    %c0_1 = arith.constant 0 : index
    %3 = vector.load %arg8[%c0, %c0_1] : memref<8x128xf32, #tpu.memory_space<vmem>>, vector<8x128xf32>
    %c0_2 = arith.constant 0 : index
    %c0_3 = arith.constant 0 : index
    %4 = vector.load %arg2[%c0_2, %c0_3] : memref<8x256xbf16, #tpu.memory_space<vmem>>, vector<8x256xbf16>
    %c0_4 = arith.constant 0 : index
    %c0_5 = arith.constant 0 : index
    %5 = vector.load %arg3[%c0_4, %c0_5] : memref<256x128xbf16, #tpu.memory_space<vmem>>, vector<256x128xbf16>
    %cst = arith.constant dense<0.000000e+00> : vector<8x128xf32>
    %6 = tpu.matmul %4, %5, %cst {dimension_numbers = #tpu.dot_dimension_numbers<[1], [0], [0], [1], [0, 0, 1, 1], [], []>} : vector<8x256xbf16>, vector<256x128xbf16>, vector<8x128xf32> -> vector<8x128xf32>
    %7 = arith.addf %3, %6 : vector<8x128xf32>
    %c0_6 = arith.constant 0 : index
    %c0_7 = arith.constant 0 : index
    %8 = vector.load %arg8[%c0_6, %c0_7] : memref<8x128xf32, #tpu.memory_space<vmem>>, vector<8x128xf32>
    tpu.vector_store %arg8[%c0_6, %c0_7], %7 {strides = array<i32>} : memref<8x128xf32, #tpu.memory_space<vmem>>, vector<8x128xf32>,
    %c0_i32_8 = arith.constant 0 : i32
    %9 = arith.cmpi eq, %arg1, %c0_i32_8 : i32
    %10 = arith.extui %9 : i1 to i32
    %c0_i32_9 = arith.constant 0 : i32
    %11 = arith.cmpi ne, %10, %c0_i32_9 : i32
    scf.if %11 {
      %c0_10 = arith.constant 0 : index
      %c0_11 = arith.constant 0 : index
      %12 = vector.load %arg8[%c0_10, %c0_11] : memref<8x128xf32, #tpu.memory_space<vmem>>, vector<8x128xf32>
      %c0_12 = arith.constant 0 : index
      %c0_13 = arith.constant 0 : index
      %13 = vector.load %arg4[%c0_12, %c0_13] : memref<1x128xf32, #tpu.memory_space<vmem>>, vector<1x128xf32>
      %14 = vector.broadcast %13 : vector<1x128xf32> to vector<8x128xf32>
      %15 = arith.addf %12, %14 : vector<8x128xf32>
      %cst_14 = arith.constant 0.000000e+00 : f32
      %16 = vector.broadcast %cst_14 : f32 to vector<8x128xf32>
      %17 = arith.maximumf %15, %16 : vector<8x128xf32>
      %18 = arith.truncf %17 : vector<8x128xf32> to vector<8x128xbf16>
      %c0_15 = arith.constant 0 : index
      %c0_16 = arith.constant 0 : index
      %19 = vector.load %arg5[%c0_15, %c0_16] : memref<128x128xbf16, #tpu.memory_space<vmem>>, vector<128x128xbf16>
      %cst_17 = arith.constant dense<0.000000e+00> : vector<8x128xf32>
      %20 = tpu.matmul %18, %19, %cst_17 {dimension_numbers = #tpu.dot_dimension_numbers<[1], [0], [0], [1], [0, 0, 1, 1], [], []>} : vector<8x128xbf16>, vector<128x128xbf16>, vector<8x128xf32> -> vector<8x128xf32>
      %c0_18 = arith.constant 0 : index
      %c0_19 = arith.constant 0 : index
      %21 = vector.load %arg6[%c0_18, %c0_19] : memref<1x128xf32, #tpu.memory_space<vmem>>, vector<1x128xf32>
      %22 = vector.broadcast %21 : vector<1x128xf32> to vector<8x128xf32>
      %23 = arith.addf %20, %22 : vector<8x128xf32>
      %c0_20 = arith.constant 0 : index
      %c0_21 = arith.constant 0 : index
      %24 = vector.load %arg7[%c0_20, %c0_21] : memref<8x128xf32, #tpu.memory_space<vmem>>, vector<8x128xf32>
      tpu.vector_store %arg7[%c0_20, %c0_21], %23 {strides = array<i32>} : memref<8x128xf32, #tpu.memory_space<vmem>>, vector<8x128xf32>,
    } else {
    }
    return
  }
  func.func @transform_0(%arg0: i32, %arg1: i32) -> (i32, i32) {
    %c0_i32 = arith.constant 0 : i32
    return %arg0, %arg1 : i32, i32
  }
  func.func @transform_1(%arg0: i32, %arg1: i32) -> (i32, i32) {
    %c0_i32 = arith.constant 0 : i32
    %c0_i32_0 = arith.constant 0 : i32
    %c0_i32_1 = arith.constant 0 : i32
    return %c0_i32, %c0_i32_0 : i32, i32
  }
  func.func @transform_2(%arg0: i32, %arg1: i32) -> (i32, i32) {
    %c0_i32 = arith.constant 0 : i32
    %c0_i32_0 = arith.constant 0 : i32
    %c0_i32_1 = arith.constant 0 : i32
    return %c0_i32, %c0_i32_0 : i32, i32
  }
  func.func @transform_3(%arg0: i32, %arg1: i32) -> (i32, i32) {
    %c0_i32 = arith.constant 0 : i32
    %c0_i32_0 = arith.constant 0 : i32
    %c0_i32_1 = arith.constant 0 : i32
    return %c0_i32, %c0_i32_0 : i32, i32
  }
  func.func @transform_4(%arg0: i32, %arg1: i32) -> (i32, i32) {
    %c0_i32 = arith.constant 0 : i32
    %c0_i32_0 = arith.constant 0 : i32
    %c0_i32_1 = arith.constant 0 : i32
    return %c0_i32, %c0_i32_0 : i32, i32
  }
  func.func @transform_5(%arg0: i32, %arg1: i32) -> (i32, i32) {
    %c0_i32 = arith.constant 0 : i32
    %c0_i32_0 = arith.constant 0 : i32
    return %arg0, %c0_i32 : i32, i32
  }
}

</mosaic_0001>

<bundles_post_ra>
// kernel: tpu_custom_call.1
= control target key start
LH: loop header
LB: loop body
LE: loop exit
PB: predicated region body
PF: predicated region fallthrough
CT: control target
= control target key end

     0   :  { %10 = vsyncpa [#allocation4], 0  ;;  %s1267_s0 = inlined_call_operand.hbm [shape: bf16[16,256], index: 0, kind: input, shape index: {}]   ;;  %s1268_s1 = inlined_call_operand.hbm [shape: bf16[256,128], index: 1, kind: input, shape index: {}]   ;;  %s1269_s2 = inlined_call_operand.vmem [shape: f32[1,128], index: 2, kind: input, shape index: {}]   ;;  %s1270_s3 = inlined_call_operand.hbm [shape: bf16[128,128], index: 3, kind: input, shape index: {}]   ;;  %s1271_s4 = inlined_call_operand.vmem [shape: f32[1,128], index: 4, kind: input, shape index: {}]   ;;  %s1272_s5 = inlined_call_operand.hbm [shape: f32[16,128], index: 5, kind: output, shape index: {}]  }
   0x1   :  { %12 = vsyncpa [#allocation4 + $0x1], 0 }
   0x2   :  { %13 = vsyncpa [#allocation7], 0 }
   0x3   :  { %14 = vsyncpa [#allocation5], 0 }
   0x4   :  { %16 = vsyncpa [#allocation5 + $0x1], 0  ;;  %s1110_s18 = smov 0   ;;  %s1112_s19 = smov 0  }
   0x5   :  { %s1114_s20 = smov 0   ;;  %s1116_s21 = smov 0  }
   0x6   :  { %s1118_s22 = smov 0   ;;  %s1120_s23 = smov 0  }
   0x7 LB: > { %s672_s24 = sadd.s32 4294967295, %s1074_s23   ;;  %p674_p0 = scmp.ge.s32.totalorder %s1074_s23, 1  ;;  %s1074_s23 = sphi %s1120_s23, %s22_s23   ;;  %s1070_s22 = sphi %s1118_s22, %s1282_s22   ;;  %s1066_s21 = sphi %s1116_s21, %s1281_s21   ;;  %s1062_s20 = sphi %s1114_s20, %s1280_s20   ;;  %s1058_s19 = sphi %s1112_s19, %s1279_s19   ;;  %s1054_s18 = sphi %s1110_s18, %s1278_s18  }
   0x8   : > { %p1144_p1 = scmp.eq.s32.totalorder %s672_s24, 0  ;;  %p177_p2 = scmp.lt.s32.totalorder %s1074_s23, 3 }
   0x9   : > { %s188_s28 = sshll.u32 %s1268_s1, 4  ;;  %s1076_s30 = smov [#allocation6]   ;;  %s189_s28 = int_to_ptr.hbm [resolvable:$true] %s188_s28 }
   0xa   : > { %p1152_p3 = pnand %p674_p0, %p177_p2  ;;  %s190_s6 = sshll.u32 %s1076_s30, 4  ;;  %s191_s6 = int_to_ptr.vmem [resolvable:$true] %s190_s6 }
   0xb   : > { %p677_p6 = scmp.ge.s32.totalorder %s1074_s23, 2  ;;  %s205_s9 = sshll.u32 %s1270_s3, 4  ;;  %s206_s9 = int_to_ptr.hbm [resolvable:$true] %s205_s9 }
   0xc   : > { %p823_p4 = pneg %p1152_p3  ;;  %s1077_s10 = smov 64  }
   0xd   : > { %s1078_s11 = smov 4   ;;  %s1079_s12 = smov [#allocation8]  }
   0xe   : > { %p824_p5 = pnand %p823_p4, %p1144_p1  ;;  %s207_s13 = sshll.u32 %s1079_s12, 4  ;;  %s208_s13 = int_to_ptr.vmem [resolvable:$true] %s207_s13 }
   0xf   : > { %s34_s14 = sadd.s32 1, %s1070_s22  ;;  %s673_s15 = sadd.s32 4294967294, %s1074_s23  }
  0x10   : > { %826 = dma.hbm_to_vmem [thread:$0]  (!%p824_p5), %s189_s28, 2048, %s191_s6, [#allocation7], %s1077_s10, %s1077_s10, %s1078_s11  }
  0x11   : > { %829 = dma.hbm_to_vmem [thread:$0]  (!%p824_p5), %s206_s9, 1024, %s208_s13, [#allocation7], %s1077_s10, %s1077_s10, %s1078_s11  }
  0x12   : > { %p36_p7 = scmp.ge.s32.totalorder %s34_s14, 2  ;;  %s43_s16 = sadd.s32 1, %s1062_s20 }
  0x13   : > { %p50_p8 = scmp.ne.s32.totalorder %s1062_s20, %s1058_s19  ;;  %p51_p9 = scmp.eq.s32.totalorder %s1074_s23, 0 }
  0x14   : > { %s1284_s14 = smov (%p36_p7, %s34_s14), 0  ;;  %p56_p10 = scmp.ne.s32.totalorder %s1058_s19, %s1054_s18 }
  0x15   : > { %s38_s17 = ssub.s32 %s1070_s22, %s1284_s14  ;;  %p164_p11 = scmp.eq.s32.totalorder %s672_s24, 1 }
  0x16   : > { %p41_p12 = scmp.eq.s32.totalorder %s38_s17, 0  ;;  %p1180_p13 = por %p1144_p1, %p56_p10 }
  0x17   : > { %p1184_p0 = por %p164_p11, %p50_p8  ;;  %p170_p2 = scmp.eq.s32.totalorder %s673_s15, 1 }
  0x18   : > { %s1189_s28 = scalar_select %p41_p12, %s1062_s20, %s43_s16  }
  0x19   : > { %p52_p4 = por %p51_p9, %p50_p8  ;;  %p1191_p5 = por %p170_p2, %p56_p10 }
  0x1a   : > { %s224_s6 = sand.u32 1, %s1062_s20   ;;  %s786_s24 = sshll.u32 %s1070_s22, 3 }
  0x1b   : > { %p840_p7 = scmp.lt.s32.totalorder %s1074_s23, 2  ;;  %s678_s7 = sshll.u32 %s224_s6, 3 }
  0x1c   : > { %s235_s10 = scalar_lea.hbm %s1267_s0, %s786_s24  ;;  %s228_s12 = scalar_lea.vmem [#allocation3], %s678_s7 }
  0x1d   : > { %s237_s11 = sshll.u32 %s235_s10, 4  ;;  %s239_s13 = sshll.u32 %s228_s12, 4  ;;  %s238_s11 = int_to_ptr.hbm [resolvable:$true] %s237_s11  ;;  %s240_s13 = int_to_ptr.vmem [resolvable:$true] %s239_s13 }
  0x1e   : > { %p831_p11 = pnand %p840_p7, %p52_p4  ;;  %s225_s15 = scalar_lea.sflag [#allocation4], %s224_s6 }
  0x1f   : > { %248 = sbr.rel (%p1152_p3) target bundleno = 346 (0x15a), region = 40  ;;  %s1204_s16 = sand.u32 (!%p1152_p3), 1, %s1058_s19  }
  0x20   : > { %833 = dma.hbm_to_vmem [thread:$0]  (!%p831_p11), %s238_s11, 128, %s240_s13, %s225_s15  }
  0x21   : > { %s682_s17 = sshll.u32 (!%p1152_p3), %s1204_s16, 3  ;;  %s251_s24 = scalar_lea.sflag (!%p1152_p3), [#allocation4], %s1204_s16 }
  0x22   : > { %s1210_s7 = scalar_lea.vmem (!%p1152_p3), [#allocation3], %s682_s17 }
  0x24   : > { %1041 = dma.done.wait (%p1180_p13), %s251_s24, 128  }
  0x25   : > { %1043 = vsyncadd (%p1180_p13), %s251_s24, 4294967168 }
  0x26   : > { %1045 = dma.done.wait (%p1144_p1), [#allocation7], 3072  }
  0x27   : > { %1047 = vsyncadd (%p1144_p1), [#allocation7], 4294964224  ;;  %v794_v0 = vld [vmem:[#allocation6 + $0x38] sm:$0xff]  ;;  %v793_v2 = vld [vmem:[#allocation6 + $0x30] sm:$0xff]  ;;  %s783_s26 = sshll.u32 %s1066_s21, 3  ;;  %s291_s12 = scalar_lea.vmem [#allocation9], %s682_s17 }
  0x28   : > { %v802_v1 = vld [vmem:[#allocation6 + $0x78] sm:$0xff]  ;;  %435 = vmatpush.bf16.msra.mxu0 %v794_v0  ;;  %v801_v3 = vld [vmem:[#allocation6 + $0x70] sm:$0xff]  ;;  %v792_v5 = vld [vmem:[#allocation6 + $0x28] sm:$0xff]  ;;  %s567_s9 = scalar_lea.hbm %s1272_s5, %s783_s26  ;;  %s569_s13 = sshll.u32 %s291_s12, 4  ;;  %s570_s13 = int_to_ptr.vmem [resolvable:$true] %s569_s13 }
  0x29   : > { %448 = vmatpush.bf16.msra.mxu1 %v802_v1  ;;  %v810_v4 = vld [vmem:[#allocation8 + $0x38] sm:$0xff]  ;;  %v800_v6 = vld [vmem:[#allocation6 + $0x68] sm:$0xff]  ;;  %v809_v7 = vld [vmem:[#allocation8 + $0x30] sm:$0xff]  ;;  %s571_s15 = sshll.u32 %s567_s9, 4  ;;  %s557_s24 = scalar_lea.sflag [#allocation5], %s1204_s16  ;;  %s572_s15 = int_to_ptr.hbm [resolvable:$true] %s571_s15 }
  0x2a   : > { %542 = vmatpush.bf16.msra.mxu2 %v810_v4  ;;  %v791_v8 = vld [vmem:[#allocation6 + $0x20] sm:$0xff]  ;;  %v808_v10 = vld [vmem:[#allocation8 + $0x28] sm:$0xff]  ;;  %v790_v11 = vld [vmem:[#allocation6 + $0x18] sm:$0xff]  ;;  %s1002_s21 = sshra.s32 %s572_s15, 4  ;;  %s1008_s26 = scalar_lea.hbm %s1272_s5, 16  ;;  %s1003_s21 = int_to_ptr.hbm [resolvable:$true] %s1002_s21 }
  0x2b   : > { %v799_v9 = vld [vmem:[#allocation6 + $0x60] sm:$0xff]  ;;  %v798_v12 = vld [vmem:[#allocation6 + $0x58] sm:$0xff]  ;;  %v789_v14 = vld [vmem:[#allocation6 + $0x10] sm:$0xff]  ;;  %p1009_p9 = scmp.lt.s32.totalorder %s1003_s21, %s1272_s5 }
  0x2c   : > { %436 = vmatpush.bf16.msra.mxu0 %v793_v2  ;;  %v807_v13 = vld [vmem:[#allocation8 + $0x20] sm:$0xff]  ;;  %v797_v15 = vld [vmem:[#allocation6 + $0x50] sm:$0xff]  ;;  %v806_v16 = vld [vmem:[#allocation8 + $0x18] sm:$0xff] }
  0x2d   : > { %449 = vmatpush.bf16.msra.mxu1 %v801_v3  ;;  %v788_v17 = vld [vmem:[#allocation6 + $0x8] sm:$0xff]  ;;  %v299_v19 = vld [vmem:[%s1210_s7] sm:$0xff]  ;;  %v787_v23 = vld [vmem:[#allocation6] sm:$0xff]  ;;  %s1004_s7 = scalar_lea.hbm %s1003_s21, 8 }
  0x2e   : > { %543 = vmatpush.bf16.msra.mxu2 %v809_v7  ;;  %v796_v18 = vld [vmem:[#allocation6 + $0x48] sm:$0xff]  ;;  %v805_v20 = vld [vmem:[#allocation8 + $0x10] sm:$0xff]  ;;  %v333_v21 = vunpack.c.l.b16 %v299_v19  ;;  %v334_v22 = vunpack.c.h.b16 %v299_v19  ;;  %v795_v24 = vld [vmem:[#allocation6 + $0x40] sm:$0xff]  ;;  %p1005_p1 = scmp.ne.s32.totalorder %s1003_s21, %s1004_s7  ;;  %p1010_p10 = scmp.lt.s32.totalorder %s1008_s26, %s1004_s7 }
  0x2f   : > { %v804_v27 = vld [vmem:[#allocation8 + $0x8] sm:$0xff]  ;;  %v803_v28 = vld [vmem:[#allocation8] sm:$0xff]  ;;  %v896_v29 = vld [vmem:[%s1269_s2] ss:$0 sm:$0xff] }
  0x30   : > { %437 = vmatpush.bf16.msra.mxu0 %v792_v5  ;;  %v335_v25 = vpack.c.b16 %v333_v21, %v333_v21  ;;  %v336_v26 = vpack.c.b16 %v334_v22, %v334_v22  ;;  %v897_v38 = vld [vmem:[%s1271_s4] ss:$0 sm:$0xff]  ;;  %p1006_p3 = pnand %p1005_p1, %p1184_p0  ;;  %p1011_p12 = por %p1010_p10, %p1009_p9 }
  0x31   : > { %450 = vmatpush.bf16.msra.mxu1 %v800_v6 }
  0x32   : > { %544 = vmatpush.bf16.msra.mxu2 %v808_v10  ;;  %p1007_p8 = pneg %p1006_p3 }
  0x34   : > { %438 = vmatpush.bf16.msra.mxu0 %v791_v8  ;;  %p1012_p13 = pnand %p1011_p12, %p1007_p8 }
  0x35   : > { %451 = vmatpush.bf16.msra.mxu1 %v799_v9 }
  0x36   : > { %545 = vmatpush.bf16.msra.mxu2 %v807_v13 }
  0x38   : > { %439 = vmatpush.bf16.msra.mxu0 %v790_v11 }
  0x39   : > { %452 = vmatpush.bf16.msra.mxu1 %v798_v12 }
  0x3a   : > { %546 = vmatpush.bf16.msra.mxu2 %v806_v16 }
  0x3c   : > { %440 = vmatpush.bf16.msra.mxu0 %v789_v14 }
  0x3d   : > { %453 = vmatpush.bf16.msra.mxu1 %v797_v15 }
  0x3e   : > { %547 = vmatpush.bf16.msra.mxu2 %v805_v20 }
  0x40   : > { %441 = vmatpush.bf16.msra.mxu0 %v788_v17 }
  0x41   : > { %454 = vmatpush.bf16.msra.mxu1 %v796_v18 }
  0x42   : > { %548 = vmatpush.bf16.msra.mxu2 %v804_v27 }
  0x44   : > { %442 = vmatpush.bf16.msra.mxu0 %v787_v23 }
  0x45   : > { %455 = vmatpush.bf16.msra.mxu1 %v795_v24 }
  0x46   : > { %549 = vmatpush.bf16.msra.mxu2 %v803_v28 }
  0x47   : > { %443 = vmatmul.bf16.vlgmr.msra.gmra.mxu0 %v335_v25 }
  0x48   : > { %456 = vmatmul.bf16.vlgmr.msra.gmra.mxu1 %v336_v26 }
  0xc4   : > { %v444_v30 = vpop.f32.mrf.mxu0 }
  0xc5   : > { %v457_v31 = vpop.f32.mrf.mxu1 }
  0xc6   : > { %v458_v32 = vadd.f32 %v457_v31, %v444_v30 }
  0xc8   : > { %v471_v33 = vadd.f32 %v896_v29, %v458_v32 }
  0xca   : > { %v472_v34 = vmax.f32 %v471_v33, 0.0 }
  0xcc   : > { %v473_v35 = vpack.c.bf16 %v472_v34, %v472_v34  ;;  %v446_v36 = vpop.f32.mrf.mxu0 }
  0xcd   : > { %v459_v37 = vpop.f32.mrf.mxu1 }
  0xce   : > { %550 = vmatmul.bf16.vlgmr.msra.gmra.mxu2 %v473_v35 }
 0x151   : > { %v551_v39 = vpop.f32.mrf.mxu2 }
 0x152   : > { %v552_v40 = vadd.f32 %v897_v38, %v551_v39 }
 0x154   : > { %555 = vst [vmem:[%s291_s12] sm:$0xff] %v552_v40 }
 0x155   : > { %1015 = shalt.err (!%p1012_p13)
}
 0x156   : > { %821 = dma.vmem_to_hbm [thread:$0]  (%p1184_p0), %s570_s13, 128, %s572_s15, %s557_s24  }
 0x159   : > { %v553_v41 = vpop.f32.mrf.mxu2 }
 0x15a PF: > { %s583_s16 = sand.u32 1, %s1054_s18   ;;  %p835_p2 = pnand %p677_p6, %p1191_p5 }
 0x15b   : > { %s584_s8 = scalar_lea.sflag [#allocation5], %s583_s16 }
 0x15c   : > { %p836_p4 = pneg %p835_p2 }
 0x15e   : > { %1049 = dma.done.wait (%p836_p4), %s584_s8, 128  }
 0x15f   : > { %1051 = vsyncadd (%p836_p4), %s584_s8, 4294967168  ;;  %s22_s23 = sadd.s32 1, %s1074_s23   ;;  %s1278_s18 = smov %s1058_s19 }
 0x160   : > { %p19_p7 = scmp.ge.s32.totalorder %s22_s23, 4   ;;  %s1279_s19 = smov %s1062_s20 }
 0x161   : > { %s1280_s20 = smov %s1189_s28  ;;  %s1281_s21 = smov %s1070_s22 }
 0x162   : > { %s1282_s22 = smov %s1284_s14  ;;  %21 = sbr.rel (!%p19_p7) target bundleno = 7 (0x7), region = 101 }
 0x167   :  { %590 = vsyncpa [#allocation4], 1 }
 0x168   :  { %592 = vsyncpa [#allocation4 + $0x1], 1 }
 0x169   :  { %593 = vsyncpa [#allocation7], 1 }
 0x16a   :  { %594 = vsyncpa [#allocation5], 1 }
 0x16b   :  { %596 = vsyncpa [#allocation5 + $0x1], 1 }

// kernel: tpu_custom_call.1
= control target key start
LH: loop header
LB: loop body
LE: loop exit
PB: predicated region body
PF: predicated region fallthrough
CT: control target
= control target key end

     0   :  { %10 = vsyncpa [#allocation4], 0  ;;  %s1267_s0 = inlined_call_operand.hbm [shape: bf16[16,256], index: 0, kind: input, shape index: {}]   ;;  %s1268_s1 = inlined_call_operand.hbm [shape: bf16[256,128], index: 1, kind: input, shape index: {}]   ;;  %s1269_s2 = inlined_call_operand.vmem [shape: f32[1,128], index: 2, kind: input, shape index: {}]   ;;  %s1270_s3 = inlined_call_operand.hbm [shape: bf16[128,128], index: 3, kind: input, shape index: {}]   ;;  %s1271_s4 = inlined_call_operand.vmem [shape: f32[1,128], index: 4, kind: input, shape index: {}]   ;;  %s1272_s5 = inlined_call_operand.hbm [shape: f32[16,128], index: 5, kind: output, shape index: {}]  }
   0x1   :  { %12 = vsyncpa [#allocation4 + $0x1], 0 }
   0x2   :  { %13 = vsyncpa [#allocation7], 0 }
   0x3   :  { %14 = vsyncpa [#allocation5], 0 }
   0x4   :  { %16 = vsyncpa [#allocation5 + $0x1], 0  ;;  %s1110_s18 = smov 0   ;;  %s1112_s19 = smov 0  }
   0x5   :  { %s1114_s20 = smov 0   ;;  %s1116_s21 = smov 0  }
   0x6   :  { %s1118_s22 = smov 0   ;;  %s1120_s23 = smov 0  }
   0x7 LB: > { %s672_s24 = sadd.s32 4294967295, %s1074_s23   ;;  %p674_p0 = scmp.ge.s32.totalorder %s1074_s23, 1  ;;  %s1074_s23 = sphi %s1120_s23, %s22_s23   ;;  %s1070_s22 = sphi %s1118_s22, %s1282_s22   ;;  %s1066_s21 = sphi %s1116_s21, %s1281_s21   ;;  %s1062_s20 = sphi %s1114_s20, %s1280_s20   ;;  %s1058_s19 = sphi %s1112_s19, %s1279_s19   ;;  %s1054_s18 = sphi %s1110_s18, %s1278_s18  }
   0x8   : > { %p1144_p1 = scmp.eq.s32.totalorder %s672_s24, 0  ;;  %p177_p2 = scmp.lt.s32.totalorder %s1074_s23, 3 }
   0x9   : > { %s188_s28 = sshll.u32 %s1268_s1, 4  ;;  %s1076_s30 = smov [#allocation6]   ;;  %s189_s28 = int_to_ptr.hbm [resolvable:$true] %s188_s28 }
   0xa   : > { %p1152_p3 = pnand %p674_p0, %p177_p2  ;;  %s190_s6 = sshll.u32 %s1076_s30, 4  ;;  %s191_s6 = int_to_ptr.vmem [resolvable:$true] %s190_s6 }
   0xb   : > { %p677_p6 = scmp.ge.s32.totalorder %s1074_s23, 2  ;;  %s205_s9 = sshll.u32 %s1270_s3, 4  ;;  %s206_s9 = int_to_ptr.hbm [resolvable:$true] %s205_s9 }
   0xc   : > { %p823_p4 = pneg %p1152_p3  ;;  %s1077_s10 = smov 64  }
   0xd   : > { %s1078_s11 = smov 4   ;;  %s1079_s12 = smov [#allocation8]  }
   0xe   : > { %p824_p5 = pnand %p823_p4, %p1144_p1  ;;  %s207_s13 = sshll.u32 %s1079_s12, 4  ;;  %s208_s13 = int_to_ptr.vmem [resolvable:$true] %s207_s13 }
   0xf   : > { %s34_s14 = sadd.s32 1, %s1070_s22  ;;  %s673_s15 = sadd.s32 4294967294, %s1074_s23  }
  0x10   : > { %826 = dma.hbm_to_vmem [thread:$0]  (!%p824_p5), %s189_s28, 2048, %s191_s6, [#allocation7], %s1077_s10, %s1077_s10, %s1078_s11  }
  0x11   : > { %829 = dma.hbm_to_vmem [thread:$0]  (!%p824_p5), %s206_s9, 1024, %s208_s13, [#allocation7], %s1077_s10, %s1077_s10, %s1078_s11  }
  0x12   : > { %p36_p7 = scmp.ge.s32.totalorder %s34_s14, 2  ;;  %s43_s16 = sadd.s32 1, %s1062_s20 }
  0x13   : > { %p50_p8 = scmp.ne.s32.totalorder %s1062_s20, %s1058_s19  ;;  %p51_p9 = scmp.eq.s32.totalorder %s1074_s23, 0 }
  0x14   : > { %s1284_s14 = smov (%p36_p7, %s34_s14), 0  ;;  %p56_p10 = scmp.ne.s32.totalorder %s1058_s19, %s1054_s18 }
  0x15   : > { %s38_s17 = ssub.s32 %s1070_s22, %s1284_s14  ;;  %p164_p11 = scmp.eq.s32.totalorder %s672_s24, 1 }
  0x16   : > { %p41_p12 = scmp.eq.s32.totalorder %s38_s17, 0  ;;  %p1180_p13 = por %p1144_p1, %p56_p10 }
  0x17   : > { %p1184_p0 = por %p164_p11, %p50_p8  ;;  %p170_p2 = scmp.eq.s32.totalorder %s673_s15, 1 }
  0x18   : > { %s1189_s28 = scalar_select %p41_p12, %s1062_s20, %s43_s16  }
  0x19   : > { %p52_p4 = por %p51_p9, %p50_p8  ;;  %p1191_p5 = por %p170_p2, %p56_p10 }
  0x1a   : > { %s224_s6 = sand.u32 1, %s1062_s20   ;;  %s786_s24 = sshll.u32 %s1070_s22, 3 }
  0x1b   : > { %p840_p7 = scmp.lt.s32.totalorder %s1074_s23, 2  ;;  %s678_s7 = sshll.u32 %s224_s6, 3 }
  0x1c   : > { %s235_s10 = scalar_lea.hbm %s1267_s0, %s786_s24  ;;  %s228_s12 = scalar_lea.vmem [#allocation3], %s678_s7 }
  0x1d   : > { %s237_s11 = sshll.u32 %s235_s10, 4  ;;  %s239_s13 = sshll.u32 %s228_s12, 4  ;;  %s238_s11 = int_to_ptr.hbm [resolvable:$true] %s237_s11  ;;  %s240_s13 = int_to_ptr.vmem [resolvable:$true] %s239_s13 }
  0x1e   : > { %p831_p11 = pnand %p840_p7, %p52_p4  ;;  %s225_s15 = scalar_lea.sflag [#allocation4], %s224_s6 }
  0x1f   : > { %248 = sbr.rel (%p1152_p3) target bundleno = 346 (0x15a), region = 40  ;;  %s1204_s16 = sand.u32 (!%p1152_p3), 1, %s1058_s19  }
  0x20   : > { %833 = dma.hbm_to_vmem [thread:$0]  (!%p831_p11), %s238_s11, 128, %s240_s13, %s225_s15  }
  0x21   : > { %s682_s17 = sshll.u32 (!%p1152_p3), %s1204_s16, 3  ;;  %s251_s24 = scalar_lea.sflag (!%p1152_p3), [#allocation4], %s1204_s16 }
  0x22   : > { %s1210_s7 = scalar_lea.vmem (!%p1152_p3), [#allocation3], %s682_s17 }
  0x24   : > { %1041 = dma.done.wait (%p1180_p13), %s251_s24, 128  }
  0x25   : > { %1043 = vsyncadd (%p1180_p13), %s251_s24, 4294967168 }
  0x26   : > { %1045 = dma.done.wait (%p1144_p1), [#allocation7], 3072  }
  0x27   : > { %1047 = vsyncadd (%p1144_p1), [#allocation7], 4294964224  ;;  %v794_v0 = vld [vmem:[#allocation6 + $0x38] sm:$0xff]  ;;  %v793_v2 = vld [vmem:[#allocation6 + $0x30] sm:$0xff]  ;;  %s783_s26 = sshll.u32 %s1066_s21, 3  ;;  %s291_s12 = scalar_lea.vmem [#allocation9], %s682_s17 }
  0x28   : > { %v802_v1 = vld [vmem:[#allocation6 + $0x78] sm:$0xff]  ;;  %435 = vmatpush.bf16.msra.mxu0 %v794_v0  ;;  %v801_v3 = vld [vmem:[#allocation6 + $0x70] sm:$0xff]  ;;  %v792_v5 = vld [vmem:[#allocation6 + $0x28] sm:$0xff]  ;;  %s567_s9 = scalar_lea.hbm %s1272_s5, %s783_s26  ;;  %s569_s13 = sshll.u32 %s291_s12, 4  ;;  %s570_s13 = int_to_ptr.vmem [resolvable:$true] %s569_s13 }
  0x29   : > { %448 = vmatpush.bf16.msra.mxu1 %v802_v1  ;;  %v810_v4 = vld [vmem:[#allocation8 + $0x38] sm:$0xff]  ;;  %v800_v6 = vld [vmem:[#allocation6 + $0x68] sm:$0xff]  ;;  %v809_v7 = vld [vmem:[#allocation8 + $0x30] sm:$0xff]  ;;  %s571_s15 = sshll.u32 %s567_s9, 4  ;;  %s557_s24 = scalar_lea.sflag [#allocation5], %s1204_s16  ;;  %s572_s15 = int_to_ptr.hbm [resolvable:$true] %s571_s15 }
  0x2a   : > { %542 = vmatpush.bf16.msra.mxu2 %v810_v4  ;;  %v791_v8 = vld [vmem:[#allocation6 + $0x20] sm:$0xff]  ;;  %v808_v10 = vld [vmem:[#allocation8 + $0x28] sm:$0xff]  ;;  %v790_v11 = vld [vmem:[#allocation6 + $0x18] sm:$0xff]  ;;  %s1002_s21 = sshra.s32 %s572_s15, 4  ;;  %s1008_s26 = scalar_lea.hbm %s1272_s5, 16  ;;  %s1003_s21 = int_to_ptr.hbm [resolvable:$true] %s1002_s21 }
  0x2b   : > { %v799_v9 = vld [vmem:[#allocation6 + $0x60] sm:$0xff]  ;;  %v798_v12 = vld [vmem:[#allocation6 + $0x58] sm:$0xff]  ;;  %v789_v14 = vld [vmem:[#allocation6 + $0x10] sm:$0xff]  ;;  %p1009_p9 = scmp.lt.s32.totalorder %s1003_s21, %s1272_s5 }
  0x2c   : > { %436 = vmatpush.bf16.msra.mxu0 %v793_v2  ;;  %v807_v13 = vld [vmem:[#allocation8 + $0x20] sm:$0xff]  ;;  %v797_v15 = vld [vmem:[#allocation6 + $0x50] sm:$0xff]  ;;  %v806_v16 = vld [vmem:[#allocation8 + $0x18] sm:$0xff] }
  0x2d   : > { %449 = vmatpush.bf16.msra.mxu1 %v801_v3  ;;  %v788_v17 = vld [vmem:[#allocation6 + $0x8] sm:$0xff]  ;;  %v299_v19 = vld [vmem:[%s1210_s7] sm:$0xff]  ;;  %v787_v23 = vld [vmem:[#allocation6] sm:$0xff]  ;;  %s1004_s7 = scalar_lea.hbm %s1003_s21, 8 }
  0x2e   : > { %543 = vmatpush.bf16.msra.mxu2 %v809_v7  ;;  %v796_v18 = vld [vmem:[#allocation6 + $0x48] sm:$0xff]  ;;  %v805_v20 = vld [vmem:[#allocation8 + $0x10] sm:$0xff]  ;;  %v333_v21 = vunpack.c.l.b16 %v299_v19  ;;  %v334_v22 = vunpack.c.h.b16 %v299_v19  ;;  %v795_v24 = vld [vmem:[#allocation6 + $0x40] sm:$0xff]  ;;  %p1005_p1 = scmp.ne.s32.totalorder %s1003_s21, %s1004_s7  ;;  %p1010_p10 = scmp.lt.s32.totalorder %s1008_s26, %s1004_s7 }
  0x2f   : > { %v804_v27 = vld [vmem:[#allocation8 + $0x8] sm:$0xff]  ;;  %v803_v28 = vld [vmem:[#allocation8] sm:$0xff]  ;;  %v896_v29 = vld [vmem:[%s1269_s2] ss:$0 sm:$0xff] }
  0x30   : > { %437 = vmatpush.bf16.msra.mxu0 %v792_v5  ;;  %v335_v25 = vpack.c.b16 %v333_v21, %v333_v21  ;;  %v336_v26 = vpack.c.b16 %v334_v22, %v334_v22  ;;  %v897_v38 = vld [vmem:[%s1271_s4] ss:$0 sm:$0xff]  ;;  %p1006_p3 = pnand %p1005_p1, %p1184_p0  ;;  %p1011_p12 = por %p1010_p10, %p1009_p9 }
  0x31   : > { %450 = vmatpush.bf16.msra.mxu1 %v800_v6 }
  0x32   : > { %544 = vmatpush.bf16.msra.mxu2 %v808_v10  ;;  %p1007_p8 = pneg %p1006_p3 }
  0x34   : > { %438 = vmatpush.bf16.msra.mxu0 %v791_v8  ;;  %p1012_p13 = pnand %p1011_p12, %p1007_p8 }
  0x35   : > { %451 = vmatpush.bf16.msra.mxu1 %v799_v9 }
  0x36   : > { %545 = vmatpush.bf16.msra.mxu2 %v807_v13 }
  0x38   : > { %439 = vmatpush.bf16.msra.mxu0 %v790_v11 }
  0x39   : > { %452 = vmatpush.bf16.msra.mxu1 %v798_v12 }
  0x3a   : > { %546 = vmatpush.bf16.msra.mxu2 %v806_v16 }
  0x3c   : > { %440 = vmatpush.bf16.msra.mxu0 %v789_v14 }
  0x3d   : > { %453 = vmatpush.bf16.msra.mxu1 %v797_v15 }
  0x3e   : > { %547 = vmatpush.bf16.msra.mxu2 %v805_v20 }
  0x40   : > { %441 = vmatpush.bf16.msra.mxu0 %v788_v17 }
  0x41   : > { %454 = vmatpush.bf16.msra.mxu1 %v796_v18 }
  0x42   : > { %548 = vmatpush.bf16.msra.mxu2 %v804_v27 }
  0x44   : > { %442 = vmatpush.bf16.msra.mxu0 %v787_v23 }
  0x45   : > { %455 = vmatpush.bf16.msra.mxu1 %v795_v24 }
  0x46   : > { %549 = vmatpush.bf16.msra.mxu2 %v803_v28 }
  0x47   : > { %443 = vmatmul.bf16.vlgmr.msra.gmra.mxu0 %v335_v25 }
  0x48   : > { %456 = vmatmul.bf16.vlgmr.msra.gmra.mxu1 %v336_v26 }
  0xc4   : > { %v444_v30 = vpop.f32.mrf.mxu0 }
  0xc5   : > { %v457_v31 = vpop.f32.mrf.mxu1 }
  0xc6   : > { %v458_v32 = vadd.f32 %v457_v31, %v444_v30 }
  0xc8   : > { %v471_v33 = vadd.f32 %v896_v29, %v458_v32 }
  0xca   : > { %v472_v34 = vmax.f32 %v471_v33, 0.0 }
  0xcc   : > { %v473_v35 = vpack.c.bf16 %v472_v34, %v472_v34  ;;  %v446_v36 = vpop.f32.mrf.mxu0 }
  0xcd   : > { %v459_v37 = vpop.f32.mrf.mxu1 }
  0xce   : > { %550 = vmatmul.bf16.vlgmr.msra.gmra.mxu2 %v473_v35 }
 0x151   : > { %v551_v39 = vpop.f32.mrf.mxu2 }
 0x152   : > { %v552_v40 = vadd.f32 %v897_v38, %v551_v39 }
 0x154   : > { %555 = vst [vmem:[%s291_s12] sm:$0xff] %v552_v40 }
 0x155   : > { %1015 = shalt.err (!%p1012_p13)
}
 0x156   : > { %821 = dma.vmem_to_hbm [thread:$0]  (%p1184_p0), %s570_s13, 128, %s572_s15, %s557_s24  }
 0x159   : > { %v553_v41 = vpop.f32.mrf.mxu2 }
 0x15a PF: > { %s583_s16 = sand.u32 1, %s1054_s18   ;;  %p835_p2 = pnand %p677_p6, %p1191_p5 }
 0x15b   : > { %s584_s8 = scalar_lea.sflag [#allocation5], %s583_s16 }
 0x15c   : > { %p836_p4 = pneg %p835_p2 }
 0x15e   : > { %1049 = dma.done.wait (%p836_p4), %s584_s8, 128  }
 0x15f   : > { %1051 = vsyncadd (%p836_p4), %s584_s8, 4294967168  ;;  %s22_s23 = sadd.s32 1, %s1074_s23   ;;  %s1278_s18 = smov %s1058_s19 }
 0x160   : > { %p19_p7 = scmp.ge.s32.totalorder %s22_s23, 4   ;;  %s1279_s19 = smov %s1062_s20 }
 0x161   : > { %s1280_s20 = smov %s1189_s28  ;;  %s1281_s21 = smov %s1070_s22 }
 0x162   : > { %s1282_s22 = smov %s1284_s14  ;;  %21 = sbr.rel (!%p19_p7) target bundleno = 7 (0x7), region = 101 }
 0x167   :  { %590 = vsyncpa [#allocation4], 1 }
 0x168   :  { %592 = vsyncpa [#allocation4 + $0x1], 1 }
 0x169   :  { %593 = vsyncpa [#allocation7], 1 }
 0x16a   :  { %594 = vsyncpa [#allocation5], 1 }
 0x16b   :  { %596 = vsyncpa [#allocation5 + $0x1], 1 }

</bundles_post_ra>
